<compile_context>
chip_gen: v7x
topology: tpu7x:2x2x1
jax: 0.10.0
libtpu: 0.0.40
codegen_flags: <defaults>
</compile_context>

<pallas_src>
import functools

import jax
import jax.numpy as jnp
from jax.experimental import pallas as pl
from jax.experimental.pallas import tpu as pltpu

LANES = 128


def _round_up(n, m):
    return (n + m - 1) // m * m


# ---------------------------------------------------------------------------
# Parameter slab layout (rows, 128), every region 8-row aligned:
#   [ w1 (ceil8(D) rows) | w2 (128 rows) | [wq|wl] (128 rows) | b1 | b2 | [bq|bl] ]
# ---------------------------------------------------------------------------
def _slab_layout(D):
    r_w1 = 0
    r_w2 = r_w1 + _round_up(D, 8)
    r_wh = r_w2 + LANES
    r_b1 = r_wh + LANES
    r_b2 = r_b1 + 8
    r_bh = r_b2 + 8
    rows = r_bh + 8
    return r_w1, r_w2, r_wh, r_b1, r_b2, r_bh, rows


def pack_params(params):
    """Pack all weights/biases into ONE (rows, 128) f32 slab.

    Call once per parameter update (NOT per forward step): the ~10 XLA scatter ops here
    cost more than the whole pallas_call at rollout shapes, so they must not sit on the
    per-step path.  Zero padding makes the kernel's full-128-lane reads exact.
    """
    D, H1 = params["w1"].shape
    H2 = params["w2"].shape[1]
    A = params["wq"].shape[1]
    # Hard limits of this packing scheme (fine for the module defaults).
    assert max(H1, H2, 2 * A) <= LANES, "hidden widths must fit one 128-lane vreg"
    assert 3 * A + H1 + H2 + 1 <= LANES, "packed output row must fit 128 lanes"

    r_w1, r_w2, r_wh, r_b1, r_b2, r_bh, rows = _slab_layout(D)
    slab = jnp.zeros((rows, LANES), jnp.float32)
    slab = slab.at[r_w1:r_w1 + D, 0:H1].set(params["w1"].astype(jnp.float32))
    slab = slab.at[r_w2:r_w2 + H1, 0:H2].set(params["w2"].astype(jnp.float32))
    wh = jnp.concatenate([params["wq"], params["wl"]], axis=1).astype(jnp.float32)
    slab = slab.at[r_wh:r_wh + H2, 0:2 * A].set(wh)
    slab = slab.at[r_b1, 0:H1].set(params["b1"].reshape(-1).astype(jnp.float32))
    slab = slab.at[r_b2, 0:H2].set(params["b2"].reshape(-1).astype(jnp.float32))
    bh = jnp.concatenate(
        [params["bq"].reshape(-1), params["bl"].reshape(-1)]).astype(jnp.float32)
    slab = slab.at[r_bh, 0:2 * A].set(bh)
    return slab, dict(D=D, H1=H1, H2=H2, A=A)


def _actor_kernel(x_ref, w_ref, out_ref, *, B, TB, D, H1, H2, A):
    r_w1, r_w2, r_wh, r_b1, r_b2, r_bh, _ = _slab_layout(D)

    x = x_ref[...]                                        # (TB, D); contract K=D directly

    # layer 1 (LayDense + ReLU) -- full-128-lane weights/bias, padding lanes are zero
    w1 = w_ref[r_w1:r_w1 + D, :]                          # (D, 128)
    b1 = w_ref[r_b1:r_b1 + 1, :]                          # (1, 128)
    h1 = jnp.maximum(jnp.dot(x, w1, preferred_element_type=jnp.float32) + b1, 0.0)
    z1 = (h1[:, 0:H1] == 0.0).astype(jnp.float32)         # "zeroes" monitor, layer 1

    # layer 2 -- K = N = 128 (rows >= H1 of the w2 region are zero; h1 cols >= H1 are zero)
    w2 = w_ref[r_w2:r_w2 + LANES, :]                      # (128, 128)
    b2 = w_ref[r_b2:r_b2 + 1, :]
    h2 = jnp.maximum(jnp.dot(h1, w2, preferred_element_type=jnp.float32) + b2, 0.0)
    z2 = (h2[:, 0:H2] == 0.0).astype(jnp.float32)         # "zeroes" monitor, layer 2

    # fused qvs|logits heads -- one MXU push instead of two, K = N = 128
    wh = w_ref[r_wh:r_wh + LANES, :]                      # (128, 128)
    bh = w_ref[r_bh:r_bh + 1, :]
    heads = jnp.dot(h2, wh, preferred_element_type=jnp.float32) + bh
    qvs = heads[:, 0:A]
    logits = heads[:, A:2 * A]

    # softmax over actions (exact reciprocal: EUP slot is idle, accuracy is free)
    m = jnp.max(logits, axis=-1, keepdims=True)
    e = jnp.exp(logits - m)
    probs = e * pl.reciprocal(jnp.sum(e, axis=-1, keepdims=True), approx=False)

    # block-partial of value = sum(qvs * probs) over VALID rows only (padded tail masked out)
    row = jax.lax.broadcasted_iota(jnp.int32, (TB, 1), 0)
    valid = (row + pl.program_id(0) * TB) < B
    partial = jnp.sum(jnp.where(valid, qvs * probs, 0.0))
    value_col = jnp.where(row == 0, partial, 0.0)          # partial stashed in block-row 0

    # ONE unmasked full-width (TB, 128) store, assembled in vregs
    pad = LANES - (3 * A + H1 + H2 + 1)
    out_ref[...] = jnp.concatenate(
        [qvs, logits, probs, z1, z2, value_col, jnp.zeros((TB, pad), jnp.float32)],
        axis=1)


def ac_shared_actor_forward(x, slab, *, D, H1, H2, A, block_b=512):
    """Forward pass (lay_norm=False path). x: (B, D) f32; slab: from pack_params()."""
    B = x.shape[0]
    assert x.shape[1] == D
    rows = slab.shape[0]

    if B <= block_b:
        TB, nb = B, 1                                     # single full-extent block, no pad
        xg = x
    else:
        TB = block_b                                      # streamed 512-row blocks
        nb = pl.cdiv(B, TB)
        Bp = nb * TB
        xg = x if Bp == B else jnp.zeros((Bp, D), x.dtype).at[:B].set(x)
    Bp = nb * TB

    kernel = functools.partial(_actor_kernel, B=B, TB=TB, D=D, H1=H1, H2=H2, A=A)
    out_slab = pl.pallas_call(
        kernel,
        out_shape=jax.ShapeDtypeStruct((Bp, LANES), jnp.float32),
        grid=(nb,),
        in_specs=[pl.BlockSpec((TB, D), lambda i: (i, 0)),
                  pl.BlockSpec((rows, LANES), lambda i: (0, 0))],   # weights VMEM-resident
        out_specs=pl.BlockSpec((TB, LANES), lambda i: (i, 0)),
        compiler_params=pltpu.CompilerParams(dimension_semantics=("parallel",)),
        cost_estimate=pl.CostEstimate(
            flops=2 * Bp * (D * LANES + 2 * LANES * LANES),
            transcendentals=Bp * A,
            bytes_accessed=4 * (Bp * D + rows * LANES + Bp * LANES),
        ),
    )(xg, slab)

    # unpack the lane-dense output slab with cheap XLA slices
    c = 0
    qvs = out_slab[:B, c:c + A];    c += A
    logits = out_slab[:B, c:c + A]; c += A
    probs = out_slab[:B, c:c + A];  c += A
    z1 = out_slab[:B, c:c + H1];    c += H1
    z2 = out_slab[:B, c:c + H2];    c += H2
    value = jnp.sum(out_slab[:, c])                        # sum of per-block partials

    # TODO(synk): lay_norm=True branch (torch.nn.LayerNorm before each layer) not implemented.
    return {"qvs": qvs, "logits": logits, "probs": probs, "value": value,
            "zeroes": [z1, z2]}


def init_params(key, observation_width=4, hidden_layers=(24, 24), num_actions=2):
    """Deterministic synthetic init (Glorot-uniform-ish weights, zero biases)."""
    dims = [observation_width, *hidden_layers]
    ks = jax.random.split(key, len(hidden_layers) + 2)
    params = {}
    for i, (din, dout) in enumerate(zip(dims[:-1], dims[1:])):
        scale = jnp.sqrt(6.0 / (din + dout))
        params[f"w{i+1}"] = jax.random.uniform(
            ks[i], (din, dout), jnp.float32, -scale, scale)
        params[f"b{i+1}"] = jnp.zeros((1, dout), jnp.float32)
    last = dims[-1]
    scale = jnp.sqrt(6.0 / (last + num_actions))
    params["wq"] = jax.random.uniform(ks[-2], (last, num_actions), jnp.float32, -scale, scale)
    params["bq"] = jnp.zeros((1, num_actions), jnp.float32)
    params["wl"] = jax.random.uniform(ks[-1], (last, num_actions), jnp.float32, -scale, scale)
    params["bl"] = jnp.zeros((1, num_actions), jnp.float32)
    return params


def _reference_forward(x, params):
    h1 = jnp.maximum(x @ params["w1"] + params["b1"], 0.0)
    h2 = jnp.maximum(h1 @ params["w2"] + params["b2"], 0.0)
    qvs = h2 @ params["wq"] + params["bq"]
    logits = h2 @ params["wl"] + params["bl"]
    probs = jax.nn.softmax(logits, axis=-1)
    value = jnp.sum(qvs * probs)
    return qvs, logits, probs, value


if __name__ == "__main__":
    key = jax.random.PRNGKey(0)
    k_obs, k_par, k_obs2 = jax.random.split(key, 3)

    D, HIDDEN, A = 4, (24, 24), 2
    params = init_params(k_par, observation_width=D, hidden_layers=HIDDEN, num_actions=A)

    slab, dims = pack_params(params)                      # hoisted: once per param update
    fwd = jax.jit(functools.partial(ac_shared_actor_forward, **dims))

    # --- small batch: single full-extent block, grid=(1,) ---
    B = 8
    obs = jax.random.normal(k_obs, (B, D), jnp.float32)
    out = fwd(obs, slab)
    jax.block_until_ready(out)

    ref_qvs, ref_logits, ref_probs, ref_value = _reference_forward(obs, params)
    assert jnp.allclose(out["qvs"], ref_qvs, atol=1e-4)
    assert jnp.allclose(out["logits"], ref_logits, atol=1e-4)
    assert jnp.allclose(out["probs"], ref_probs, atol=1e-4)
    assert jnp.allclose(out["value"], ref_value, rtol=1e-4, atol=1e-3)
    assert out["zeroes"][0].shape == (B, HIDDEN[0])
    assert out["zeroes"][1].shape == (B, HIDDEN[1])

    # --- larger rollout batch: streamed 512-row blocks, parallel grid, masked tail ---
    B2 = 1037
    obs2 = jax.random.normal(k_obs2, (B2, D), jnp.float32)
    out2 = fwd(obs2, slab)
    jax.block_until_ready(out2)
    r_qvs2, r_logits2, r_probs2, r_value2 = _reference_forward(obs2, params)
    assert out2["qvs"].shape == (B2, A)
    assert jnp.allclose(out2["qvs"], r_qvs2, atol=1e-4)
    assert jnp.allclose(out2["probs"], r_probs2, atol=1e-4)
    assert jnp.allclose(out2["value"], r_value2, rtol=1e-4, atol=1e-2)

    print("KERNEL_OK")
</pallas_src>

<mosaic_0001>
module attributes {stable_mosaic.version = 11 : i64} {
  func.func @_actor_kernel(%arg0: i32, %arg1: memref<8x4xf32, #tpu.memory_space<vmem>>, %arg2: memref<288x128xf32, #tpu.memory_space<vmem>>, %arg3: memref<8x128xf32, #tpu.memory_space<vmem>>) attributes {dimension_semantics = [#tpu.dimension_semantics<parallel>], iteration_bounds = array<i64: 1>, scalar_prefetch = 0 : i64, scratch_operands = 0 : i64, tpu.core_type = #tpu.core_type<tc>, window_params = [{transform_indices = @transform_0, window_bounds = array<i64: 8, 4>}, {pipeline_mode = #tpu.pipeline_mode<synchronous>, transform_indices = @transform_1, window_bounds = array<i64: 288, 128>}, {transform_indices = @transform_2, window_bounds = array<i64: 8, 128>}]} {
    %c0 = arith.constant 0 : index
    %c0_0 = arith.constant 0 : index
    %0 = vector.load %arg1[%c0, %c0_0] : memref<8x4xf32, #tpu.memory_space<vmem>>, vector<8x4xf32>
    %c0_1 = arith.constant 0 : index
    %c0_2 = arith.constant 0 : index
    %1 = vector.load %arg2[%c0_1, %c0_2] : memref<288x128xf32, #tpu.memory_space<vmem>>, vector<4x128xf32>
    %c264 = arith.constant 264 : index
    %c0_3 = arith.constant 0 : index
    %2 = vector.load %arg2[%c264, %c0_3] : memref<288x128xf32, #tpu.memory_space<vmem>>, vector<1x128xf32>
    %cst = arith.constant dense<0.000000e+00> : vector<8x128xf32>
    %3 = tpu.matmul %0, %1, %cst {dimension_numbers = #tpu.dot_dimension_numbers<[1], [0], [0], [1], [0, 0, 1, 1], [], []>} : vector<8x4xf32>, vector<4x128xf32>, vector<8x128xf32> -> vector<8x128xf32>
    %4 = vector.broadcast %2 : vector<1x128xf32> to vector<8x128xf32>
    %5 = arith.addf %3, %4 : vector<8x128xf32>
    %cst_4 = arith.constant 0.000000e+00 : f32
    %6 = vector.broadcast %cst_4 : f32 to vector<8x128xf32>
    %7 = arith.maximumf %5, %6 : vector<8x128xf32>
    %8 = vector.extract_strided_slice %7 {offsets = [0, 0], sizes = [8, 24], strides = [1, 1]} : vector<8x128xf32> to vector<8x24xf32>
    %cst_5 = arith.constant 0.000000e+00 : f32
    %9 = vector.broadcast %cst_5 : f32 to vector<8x24xf32>
    %10 = arith.cmpf oeq, %8, %9 : vector<8x24xf32>
    %11 = arith.extui %10 : vector<8x24xi1> to vector<8x24xi32>
    %12 = arith.sitofp %11 : vector<8x24xi32> to vector<8x24xf32>
    %c8 = arith.constant 8 : index
    %c0_6 = arith.constant 0 : index
    %13 = vector.load %arg2[%c8, %c0_6] : memref<288x128xf32, #tpu.memory_space<vmem>>, vector<128x128xf32>
    %c272 = arith.constant 272 : index
    %c0_7 = arith.constant 0 : index
    %14 = vector.load %arg2[%c272, %c0_7] : memref<288x128xf32, #tpu.memory_space<vmem>>, vector<1x128xf32>
    %cst_8 = arith.constant dense<0.000000e+00> : vector<8x128xf32>
    %15 = tpu.matmul %7, %13, %cst_8 {dimension_numbers = #tpu.dot_dimension_numbers<[1], [0], [0], [1], [0, 0, 1, 1], [], []>} : vector<8x128xf32>, vector<128x128xf32>, vector<8x128xf32> -> vector<8x128xf32>
    %16 = vector.broadcast %14 : vector<1x128xf32> to vector<8x128xf32>
    %17 = arith.addf %15, %16 : vector<8x128xf32>
    %cst_9 = arith.constant 0.000000e+00 : f32
    %18 = vector.broadcast %cst_9 : f32 to vector<8x128xf32>
    %19 = arith.maximumf %17, %18 : vector<8x128xf32>
    %20 = vector.extract_strided_slice %19 {offsets = [0, 0], sizes = [8, 24], strides = [1, 1]} : vector<8x128xf32> to vector<8x24xf32>
    %cst_10 = arith.constant 0.000000e+00 : f32
    %21 = vector.broadcast %cst_10 : f32 to vector<8x24xf32>
    %22 = arith.cmpf oeq, %20, %21 : vector<8x24xf32>
    %23 = arith.extui %22 : vector<8x24xi1> to vector<8x24xi32>
    %24 = arith.sitofp %23 : vector<8x24xi32> to vector<8x24xf32>
    %c136 = arith.constant 136 : index
    %c0_11 = arith.constant 0 : index
    %25 = vector.load %arg2[%c136, %c0_11] : memref<288x128xf32, #tpu.memory_space<vmem>>, vector<128x128xf32>
    %c280 = arith.constant 280 : index
    %c0_12 = arith.constant 0 : index
    %26 = vector.load %arg2[%c280, %c0_12] : memref<288x128xf32, #tpu.memory_space<vmem>>, vector<1x128xf32>
    %cst_13 = arith.constant dense<0.000000e+00> : vector<8x128xf32>
    %27 = tpu.matmul %19, %25, %cst_13 {dimension_numbers = #tpu.dot_dimension_numbers<[1], [0], [0], [1], [0, 0, 1, 1], [], []>} : vector<8x128xf32>, vector<128x128xf32>, vector<8x128xf32> -> vector<8x128xf32>
    %28 = vector.broadcast %26 : vector<1x128xf32> to vector<8x128xf32>
    %29 = arith.addf %27, %28 : vector<8x128xf32>
    %30 = vector.extract_strided_slice %29 {offsets = [0, 0], sizes = [8, 2], strides = [1, 1]} : vector<8x128xf32> to vector<8x2xf32>
    %31 = vector.extract_strided_slice %29 {offsets = [0, 2], sizes = [8, 2], strides = [1, 1]} : vector<8x128xf32> to vector<8x2xf32>
    %cst_14 = arith.constant dense<0xFF800000> : vector<8xf32>
    %32 = vector.multi_reduction <maximumf>, %31, %cst_14 [1] : vector<8x2xf32> to vector<8xf32>
    %33 = vector.shape_cast %32 : vector<8xf32> to vector<8x1xf32>
    %34 = vector.broadcast %33 : vector<8x1xf32> to vector<8x2xf32>
    %35 = arith.subf %31, %34 : vector<8x2xf32>
    %36 = math.exp %35 : vector<8x2xf32>
    %cst_15 = arith.constant dense<0.000000e+00> : vector<8xf32>
    %37 = vector.multi_reduction <add>, %36, %cst_15 [1] : vector<8x2xf32> to vector<8xf32>
    %38 = vector.shape_cast %37 : vector<8xf32> to vector<8x1xf32>
    %39 = tpu.reciprocal %38 : vector<8x1xf32> -> vector<8x1xf32>
    %40 = vector.broadcast %39 : vector<8x1xf32> to vector<8x2xf32>
    %41 = arith.mulf %36, %40 : vector<8x2xf32>
    %42 = tpu.iota {dimensions = array<i32: 0>} : vector<8x1xi32>
    %c8_i32 = arith.constant 8 : i32
    %43 = arith.muli %arg0, %c8_i32 : i32
    %44 = vector.broadcast %43 : i32 to vector<8x1xi32>
    %45 = arith.addi %42, %44 : vector<8x1xi32>
    %c8_i32_16 = arith.constant 8 : i32
    %46 = vector.broadcast %c8_i32_16 : i32 to vector<8x1xi32>
    %47 = arith.cmpi slt, %45, %46 : vector<8x1xi32>
    %48 = arith.mulf %30, %41 : vector<8x2xf32>
    %cst_17 = arith.constant 0.000000e+00 : f32
    %49 = vector.shape_cast %47 : vector<8x1xi1> to vector<8x1xi1>
    %50 = vector.broadcast %49 : vector<8x1xi1> to vector<8x2xi1>
    %51 = vector.broadcast %cst_17 : f32 to vector<8x2xf32>
    %52 = arith.select %50, %48, %51 : vector<8x2xi1>, vector<8x2xf32>
    %53 = vector.shape_cast %52 : vector<8x2xf32> to vector<1x8x2xf32>
    %cst_18 = arith.constant dense<0.000000e+00> : vector<1xf32>
    %54 = vector.multi_reduction <add>, %53, %cst_18 [1, 2] : vector<1x8x2xf32> to vector<1xf32>
    %55 = vector.shape_cast %54 : vector<1xf32> to vector<1x1x1xf32>
    %56 = vector.extract %55[0, 0, 0] : f32 from vector<1x1x1xf32>
    %c0_i32 = arith.constant 0 : i32
    %57 = vector.broadcast %c0_i32 : i32 to vector<8x1xi32>
    %58 = arith.cmpi eq, %42, %57 : vector<8x1xi32>
    %cst_19 = arith.constant 0.000000e+00 : f32
    %59 = vector.broadcast %56 : f32 to vector<8x1xf32>
    %60 = vector.broadcast %cst_19 : f32 to vector<8x1xf32>
    %61 = arith.select %58, %59, %60 : vector<8x1xi1>, vector<8x1xf32>
    %cst_20 = arith.constant 0.000000e+00 : f32
    %62 = vector.broadcast %cst_20 : f32 to vector<8x73xf32>
    %63 = tpu.concatenate %30, %31, %41, %12, %24, %61, %62 in 1 : vector<8x2xf32>, vector<8x2xf32>, vector<8x2xf32>, vector<8x24xf32>, vector<8x24xf32>, vector<8x1xf32>, vector<8x73xf32> -> vector<8x128xf32>
    %c0_21 = arith.constant 0 : index
    %c0_22 = arith.constant 0 : index
    %64 = vector.load %arg3[%c0_21, %c0_22] : memref<8x128xf32, #tpu.memory_space<vmem>>, vector<8x128xf32>
    tpu.vector_store %arg3[%c0_21, %c0_22], %63 {strides = array<i32>} : memref<8x128xf32, #tpu.memory_space<vmem>>, vector<8x128xf32>,
    return
  }
  func.func @transform_0(%arg0: i32) -> (i32, i32) {
    %c0_i32 = arith.constant 0 : i32
    %c0_i32_0 = arith.constant 0 : i32
    return %arg0, %c0_i32 : i32, i32
  }
  func.func @transform_1(%arg0: i32) -> (i32, i32) {
    %c0_i32 = arith.constant 0 : i32
    %c0_i32_0 = arith.constant 0 : i32
    %c0_i32_1 = arith.constant 0 : i32
    return %c0_i32, %c0_i32_0 : i32, i32
  }
  func.func @transform_2(%arg0: i32) -> (i32, i32) {
    %c0_i32 = arith.constant 0 : i32
    %c0_i32_0 = arith.constant 0 : i32
    return %arg0, %c0_i32 : i32, i32
  }
}

</mosaic_0001>

<bundles_post_ra>
// kernel: ac_shared_actor_forward.1
= control target key start
LH: loop header
LB: loop body
LE: loop exit
PB: predicated region body
PF: predicated region fallthrough
CT: control target
= control target key end

     0   :  { %7 = vsyncpa [#allocation3], 0  ;;  %s576_s9 = smov [#allocation2]   ;;  %s648_s0 = inlined_call_operand.vmem [shape: f32[8,4], index: 0, kind: input, shape index: {}]   ;;  %s649_s1 = inlined_call_operand.hbm [shape: f32[288,128], index: 1, kind: input, shape index: {}]   ;;  %s650_s2 = inlined_call_operand.vmem [shape: f32[8,128], index: 2, kind: output, shape index: {}]  }
   0x1   :  { %s15_s10 = sshll.u32 %s576_s9, 4  ;;  %s552_s13 = scalar_lea.hbm %s649_s1, 4608  ;;  %s16_s10 = int_to_ptr.vmem [resolvable:$true] %s15_s10 }
   0x2   :  { %p553_p0 = scmp.ne.s32.totalorder %s649_s1, %s552_s13  ;;  %p556_p1 = scmp.lt.u32.totalorder %s552_s13, %s649_s1 }
   0x4   :  { %p558_p2 = pnand %p556_p1, %p553_p0 }
   0x6   :  { %561 = shalt.err (!%p558_p2)
}
   0x7   :  { %s562_s18 = scalar_lea.vmem %s16_s10, 4608  ;;  %p567_p4 = scmp.lt.s32.totalorder %s16_s10, %s16_s10 }
   0x8   :  { %p563_p3 = scmp.ne.s32.totalorder %s16_s10, %s562_s18  ;;  %p568_p5 = scmp.lt.s32.totalorder %s562_s18, %s562_s18 }
   0xa   :  { %p569_p6 = por %p568_p5, %p567_p4 }
   0xc   :  { %p570_p7 = pnand %p569_p6, %p563_p3 }
   0xe   :  { %573 = shalt.err (!%p570_p7)
}
   0xf   :  { %s577_s19 = smov 128   ;;  %s578_s20 = smov 8  }
  0x10   :  { %21 = dma.hbm_to_vmem [thread:$0]  %s649_s1, 4608, %s16_s10, [#allocation3], %s577_s19, %s577_s19, %s578_s20  }
  0x11   :  { %574 = dma.done.wait [#allocation3], 4608  }
  0x12   :  { %575 = vsyncadd [#allocation3], 4294962688  ;;  %v579_v0 = vmov 0.0   ;;  %vm580_vm0 = vmmov 0   ;;  %v581_v1 = vmov 0.0|0.0   ;;  %vm36_vm1 = vcmask 1043456  }
  0x13   :  { %413 = vmatprep.subr.mxu0 %v579_v0  ;;  %415 = vmatprep.mubr.msk.f32.mxu0 %vm580_vm0, %v579_v0  ;;  %vm32_vm2 = vcmask 31744   ;;  %v26_v2 = vld [vmem:[#allocation2] sm:$0xf]  ;;  %v114_v4 = vld [vmem:[#allocation2 + $0x8] sm:$0xff]  ;;  %v115_v5 = vld [vmem:[#allocation2 + $0x10] sm:$0xff]  ;;  %vm300_vm3 = vcmask 31760  }
  0x14   :  { %488 = vmatprep.subr.bf16.mxu1 %v581_v1  ;;  %450 = vmatprep.mubr.msk.f32.mxu1 %vm580_vm0, %v579_v0  ;;  %v25_v3 = vld [vmem:[%s648_s0] sm:$0xff]  ;;  %v116_v6 = vld [vmem:[#allocation2 + $0x18] sm:$0xff]  ;;  %v489_v8 = vpack.c.bf16 %v115_v5, %v114_v4  ;;  %v118_v10 = vld [vmem:[#allocation2 + $0x28] sm:$0xff]  ;;  %s582_s0 = smov 126   ;;  %vm311_vm4 = vcmask 15360   ;;  %s583_s24 = smov 2  }
  0x15   :  { %414 = vmatpush3.msk.msra.mxu0 %vm36_vm1, %v26_v2  ;;  %v117_v7 = vld [vmem:[#allocation2 + $0x20] sm:$0xff]  ;;  %v119_v11 = vld [vmem:[#allocation2 + $0x30] sm:$0xff]  ;;  %v120_v13 = vld [vmem:[#allocation2 + $0x38] sm:$0xff]  ;;  %s584_s25 = smov 6   ;;  %s585_s26 = smov 30   ;;  %vm356_vm7 = vcmask 48128  }
  0x16   :  { %416 = vmatmul.mubr.msk.f32.vlgmr.msra.gmra.mrb[0].mxu0 %vm32_vm2, %v25_v3  ;;  %512 = vmatprep.subr.bf16.mxu0 %v581_v1  ;;  %v492_v9 = vpack.c.bf16 %v117_v7, %v116_v6  ;;  %v495_v12 = vpack.c.bf16 %v119_v11, %v118_v10  ;;  %v121_v14 = vld [vmem:[#allocation2 + $0x40] sm:$0xff]  ;;  %v122_v16 = vld [vmem:[#allocation2 + $0x48] sm:$0xff]  ;;  %v123_v17 = vld [vmem:[#allocation2 + $0x50] sm:$0xff]  ;;  %vm358_vm8 = vcmask 244736   ;;  %vm360_vm10 = vcmask 441344  }
  0x17   :  { %485 = vmatprep.mubr.msk.f32.mxu0 %vm580_vm0, %v579_v0  ;;  %490 = vmatpush3.bf16.msra.mxu1 %v489_v8  ;;  %v498_v15 = vpack.c.bf16 %v121_v14, %v120_v13  ;;  %v501_v18 = vpack.c.bf16 %v123_v17, %v122_v16  ;;  %v124_v19 = vld [vmem:[#allocation2 + $0x58] sm:$0xff]  ;;  %v125_v20 = vld [vmem:[#allocation2 + $0x60] sm:$0xff]  ;;  %v126_v22 = vld [vmem:[#allocation2 + $0x68] sm:$0xff]  ;;  %vm362_vm11 = vcmask 449536  }
  0x18   :  { %491 = vmatprep.subr.bf16.mxu1 %v581_v1  ;;  %v504_v21 = vpack.c.bf16 %v125_v20, %v124_v19  ;;  %v127_v23 = vld [vmem:[#allocation2 + $0x70] sm:$0xff]  ;;  %v128_v25 = vld [vmem:[#allocation2 + $0x78] sm:$0xff]  ;;  %v129_v26 = vld [vmem:[#allocation2 + $0x80] sm:$0xff] }
  0x19   :  { %v507_v24 = vpack.c.bf16 %v127_v23, %v126_v22  ;;  %v510_v27 = vpack.c.bf16 %v129_v26, %v128_v25  ;;  %v209_v28 = vld [vmem:[#allocation2 + $0x88] sm:$0xff]  ;;  %v210_v29 = vld [vmem:[#allocation2 + $0x90] sm:$0xff]  ;;  %v211_v30 = vld [vmem:[#allocation2 + $0x98] sm:$0xff]  ;;  %v317_v26 = vlaneseq }
  0x1a   :  { %v513_v31 = vpack.c.bf16 %v210_v29, %v209_v28  ;;  %v212_v32 = vld [vmem:[#allocation2 + $0xa0] sm:$0xff]  ;;  %v213_v34 = vld [vmem:[#allocation2 + $0xa8] sm:$0xff]  ;;  %v214_v35 = vld [vmem:[#allocation2 + $0xb0] sm:$0xff] }
  0x1b   :  { %493 = vmatpush3.bf16.msra.mxu1 %v492_v9  ;;  %v516_v33 = vpack.c.bf16 %v212_v32, %v211_v30  ;;  %v519_v36 = vpack.c.bf16 %v214_v35, %v213_v34  ;;  %v215_v37 = vld [vmem:[#allocation2 + $0xb8] sm:$0xff]  ;;  %v216_v38 = vld [vmem:[#allocation2 + $0xc0] sm:$0xff]  ;;  %v217_v40 = vld [vmem:[#allocation2 + $0xc8] sm:$0xff]  ;;  %v318_v28 = vshrl.u32 %v317_v26, 7 }
  0x1c   :  { %494 = vmatprep.subr.bf16.mxu1 %v581_v1  ;;  %514 = vmatpush3.bf16.msra.mxu0 %v513_v31  ;;  %v522_v39 = vpack.c.bf16 %v216_v38, %v215_v37  ;;  %v218_v41 = vld [vmem:[#allocation2 + $0xd0] sm:$0xff]  ;;  %v219_v43 = vld [vmem:[#allocation2 + $0xd8] sm:$0xff]  ;;  %v220_v44 = vld [vmem:[#allocation2 + $0xe0] sm:$0xff] }
  0x1d   :  { %515 = vmatprep.subr.bf16.mxu0 %v581_v1  ;;  %v525_v42 = vpack.c.bf16 %v218_v41, %v217_v40  ;;  %v528_v45 = vpack.c.bf16 %v220_v44, %v219_v43  ;;  %v221_v46 = vld [vmem:[#allocation2 + $0xe8] sm:$0xff]  ;;  %v222_v47 = vld [vmem:[#allocation2 + $0xf0] sm:$0xff]  ;;  %v223_v54 = vld [vmem:[#allocation2 + $0xf8] sm:$0xff]  ;;  %vm341_vm9 = vcmp.eq.s32.totalorder %v318_v28, 0 }
  0x1e   :  { %v531_v48 = vpack.c.bf16 %v222_v47, %v221_v46  ;;  %v370_v49 = vld [vmem:[#allocation2 + $0x108] ss:$0 sm:$0xff]  ;;  %v224_v55 = vld [vmem:[#allocation2 + $0x100] sm:$0xff]  ;;  %v374_v57 = vld [vmem:[#allocation2 + $0x110] ss:$0 sm:$0xff] }
  0x1f   :  { %496 = vmatpush3.bf16.msra.mxu1 %v495_v12  ;;  %v534_v56 = vpack.c.bf16 %v224_v55, %v223_v54  ;;  %v376_v62 = vld [vmem:[#allocation2 + $0x118] ss:$0 sm:$0xff] }
  0x20   :  { %497 = vmatprep.subr.bf16.mxu1 %v581_v1  ;;  %517 = vmatpush3.bf16.msra.mxu0 %v516_v33 }
  0x21   :  { %518 = vmatprep.subr.bf16.mxu0 %v581_v1 }
  0x23   :  { %499 = vmatpush3.bf16.msra.mxu1 %v498_v15 }
  0x24   :  { %500 = vmatprep.subr.bf16.mxu1 %v581_v1  ;;  %520 = vmatpush3.bf16.msra.mxu0 %v519_v36 }
  0x25   :  { %521 = vmatprep.subr.bf16.mxu0 %v581_v1 }
  0x27   :  { %502 = vmatpush3.bf16.msra.mxu1 %v501_v18 }
  0x28   :  { %503 = vmatprep.subr.bf16.mxu1 %v581_v1  ;;  %523 = vmatpush3.bf16.msra.mxu0 %v522_v39 }
  0x29   :  { %524 = vmatprep.subr.bf16.mxu0 %v581_v1 }
  0x2b   :  { %505 = vmatpush3.bf16.msra.mxu1 %v504_v21 }
  0x2c   :  { %506 = vmatprep.subr.bf16.mxu1 %v581_v1  ;;  %526 = vmatpush3.bf16.msra.mxu0 %v525_v42 }
  0x2d   :  { %527 = vmatprep.subr.bf16.mxu0 %v581_v1 }
  0x2f   :  { %508 = vmatpush3.bf16.msra.mxu1 %v507_v24 }
  0x30   :  { %509 = vmatprep.subr.bf16.mxu1 %v581_v1  ;;  %529 = vmatpush3.bf16.msra.mxu0 %v528_v45 }
  0x31   :  { %530 = vmatprep.subr.bf16.mxu0 %v581_v1 }
  0x33   :  { %511 = vmatpush3.bf16.msra.mxu1 %v510_v27 }
  0x34   :  { %532 = vmatpush3.bf16.msra.mxu0 %v531_v48 }
  0x35   :  { %533 = vmatprep.subr.bf16.mxu0 %v581_v1 }
  0x38   :  { %535 = vmatpush3.bf16.msra.mxu0 %v534_v56 }
  0xe9   :  { %v106_v50 = vpop.f32.mrb[0].mxu0 }
  0xea   :  { %v107_v51 = vadd.f32 %v370_v49, %v106_v50  ;;  %v417_v52 = vpop.f32.mrb[1].mxu0 }
  0xec   :  { %v110_v53 = vmax.f32 %v107_v51, 0.0 }
  0xee   :  { %451 = vmatmul.mubr.f32.vlgmr.msra.gmra.mrb[0].mxu1 %v110_v53  ;;  %vm111_vm5 = vcmp.eq.f32.partialorder %v110_v53, 0.0 }
  0xef   :  { %v373_v13 = vsel %vm111_vm5, 1.0, %v579_v0 }
 0x1c1   :  { %v201_v58 = vpop.f32.mrb[0].mxu1 }
 0x1c2   :  { %v202_v59 = vadd.f32 %v374_v57, %v201_v58  ;;  %v452_v60 = vpop.f32.mrb[1].mxu1 }
 0x1c4   :  { %v205_v61 = vmax.f32 %v202_v59, 0.0 }
 0x1c6   :  { %486 = vmatmul.mubr.f32.vlgmr.msra.gmra.mrb[2].mxu0 %v205_v61  ;;  %vm206_vm6 = vcmp.eq.f32.partialorder %v205_v61, 0.0 }
 0x1c7   :  { %v375_v14 = vsel %vm206_vm6, 1.0, %v579_v0 }
 0x299   :  { %v296_v63 = vpop.f32.mrb[2].mxu0 }
 0x29a   :  { %v297_v1 = vadd.f32 %v376_v62, %v296_v63  ;;  %v487_v2 = vpop.f32.mrb[3].mxu0 }
 0x29c   :  { %v301_v3 = vsel %vm300_vm3, %v297_v1, -inf }
 0x29d   :  { %302 = vmax.xlane.f32.xlu0 %v301_v3 }
 0x32a   :  { %v303_v4 = vpop.xlane.xlu0 %302 }
 0x32b   :  { %v304_v5 = vsub.f32 %v297_v1, %v303_v4 }
 0x32d   :  { %v305_v6 = vmul.f32 1.442695, %v304_v5 }
 0x32f   :  { %548 = vpow2.f32 %v305_v6 }
 0x339   :  { %v549_v7 = vpop.eup %548 }
 0x33a   :  { %308 = vrot.lane.b32.xlu0 %v549_v7, %s582_s0 }
 0x3ac   :  { %v309_v8 = vpop.permute.xlu0 %308 }
 0x3ad   :  { %v312_v9 = vsel %vm311_vm4, %v309_v8, 0.0 }
 0x3ae   :  { %313 = vadd.xlane.f32.xlu1 %v312_v9 }
 0x43b   :  { %v314_v10 = vpop.xlane.xlu1 %313 }
 0x43c   :  { %550 = vrcp.f32 %v314_v10 }
 0x446   :  { %v551_v11 = vpop.eup %550 }
 0x447   :  { %v316_v12 = vmul.f32 %v551_v11, %v549_v7 }
 0x449   :  { %344 = vrot.lane.b32.xlu0 %v316_v12, %s583_s24  ;;  %324 = vrot.lane.b32.xlu1 %v316_v12, %s582_s0 }
 0x44d   :  { %348 = vrot.lane.b32.xlu0 %v373_v13, %s584_s25 }
 0x451   :  { %352 = vrot.lane.b32.xlu0 %v375_v14, %s585_s26 }
 0x4bb   :  { %v325_v15 = vpop.permute.xlu1 %324  ;;  %v345_v25 = vpop.permute.xlu0 %344 }
 0x4bc   :  { %v327_v16 = vmul.f32 %v325_v15, %v297_v1  ;;  %v355_v29 = vsel %vm32_vm2, %v297_v1, %v345_v25 }
 0x4be   :  { %v331_v17 = vsel %vm311_vm4, %v327_v16, 0.0 }
 0x4bf   :  { %332 = vadd.xlane.f32.xlu1 %v331_v17  ;;  %v349_v27 = vpop.permute.xlu0 %348 }
 0x4c0   :  { %v357_v30 = vsel %vm356_vm7, %v355_v29, %v349_v27 }
 0x4c3   :  { %v353_v0 = vpop.permute.xlu0 %352 }
 0x4c4   :  { %v359_v32 = vsel %vm358_vm8, %v357_v30, %v353_v0 }
 0x54c   :  { %v333_v18 = vpop.xlane.xlu1 %332 }
 0x54d   :  { %v334_v19 = vrot.slane %v333_v18, 4 }
 0x54f   :  { %v335_v20 = vadd.f32 %v334_v19, %v333_v18 }
 0x551   :  { %v336_v21 = vrot.slane %v335_v20, 2 }
 0x553   :  { %v337_v22 = vadd.f32 %v336_v21, %v335_v20 }
 0x555   :  { %v338_v23 = vrot.slane %v337_v22, 1 }
 0x557   :  { %v339_v24 = vadd.f32 %v338_v23, %v337_v22 }
 0x559   :  { %536 = vpush %v339_v24 }
 0x58a   :  { %s537_s27 = spop %536 }
 0x58b   :  { %v342_v31 = vstv %s537_s27 }
 0x58c   :  { %v343_v33 = vsel %vm341_vm9, %v342_v31, 0.0 }
 0x58d   :  { %v361_v34 = vsel %vm360_vm10, %v359_v32, %v343_v33 }
 0x58e   :  { %v363_v35 = vsel %vm362_vm11, %v361_v34, 0.0 }
 0x58f   :  { %364 = vst [vmem:[%s650_s2] sm:$0xff] %v363_v35 }
 0x590   :  { %369 = vsyncpa [#allocation3], 1 }

</bundles_post_ra>
